<compile_context>
chip_gen: v7x
topology: tpu7x:2x2x1
jax: 0.10.0
libtpu: 0.0.40
codegen_flags: <defaults>
</compile_context>

<pallas_src>
import math

import jax
import jax.numpy as jnp
from jax.experimental import pallas as pl
from jax.experimental.pallas import tpu as pltpu


def _pe_add_kernel(x_ref, pe_ref, o_ref):
    # x block: (bt, ts, D); pe block: (ts, D) broadcasts over the bt rows.
    acc = x_ref[...].astype(jnp.float32) + pe_ref[...]
    o_ref[...] = acc.astype(o_ref.dtype)


def make_positional_encoding_table(d_model, max_len=5000, dtype=jnp.float32):
    """Build the `pe` buffer exactly as the PyTorch module __init__ does."""
    assert d_model % 2 == 0, (
        "d_model must be even (same constraint as the PyTorch sin/cos recipe)"
    )
    position = jnp.arange(max_len, dtype=jnp.float32)[:, None]          # [max_len, 1]
    div_term = jnp.exp(
        jnp.arange(0, d_model, 2, dtype=jnp.float32) * (-math.log(10000.0) / d_model)
    )                                                                    # [d_model//2]
    ang = position * div_term                                            # [max_len, d_model//2]
    pe = jnp.zeros((max_len, d_model), dtype=jnp.float32)
    pe = pe.at[:, 0::2].set(jnp.sin(ang))
    pe = pe.at[:, 1::2].set(jnp.cos(ang))
    return pe.astype(dtype)


def _sublane_multiple(itemsize):
    # 32-bit rows tile in groups of 8 sublanes; bf16 packs 2 rows/sublane -> 16;
    # int8/fp8 pack 4 -> 32.
    return max(8, 32 // int(itemsize))


def _choose_tiles(B, S, D, itemsize, target_block_bytes=4 << 20):
    """Pick (bt, ts) for a (bt, ts, D) x/out block, VMEM-budget aware."""
    sub = _sublane_multiple(itemsize)
    row_bytes = S * D * itemsize                     # one full (S, D) slab
    if row_bytes <= target_block_bytes:
        # Whole (S, D) per block; tile only along batch.
        ts = S
        bt = min(B, max(1, target_block_bytes // row_bytes))
    else:
        # One (S, D) slab is too big: tile along S as well (second grid axis),
        # keeping the sublane dim a legal/packing-friendly multiple.
        bt = 1
        ts = (target_block_bytes // (D * itemsize)) // sub * sub
        if ts <= 0 or ts >= S:
            ts = S                                   # full extent is always legal

    # Guarantee >= 2 grid steps when possible so ("parallel", "parallel") can
    # actually shard across v7x's two TensorCores (one extra step is ~0.35 us).
    if bt >= B and ts >= S:
        if B >= 2:
            bt = -(-B // 2)
        elif S >= 2 * sub:
            ts = max(sub, ((S // 2) // sub) * sub)
    return bt, ts


def positional_encoding_forward(x, pe):
    """x: [B, S, D]; pe: [max_len, D].  Returns x + pe[:S] (eval-mode dropout)."""
    B, S, D = x.shape
    assert S <= pe.shape[0], f"seq_len {S} exceeds max_len {pe.shape[0]}"
    assert D == pe.shape[1], f"d_model mismatch: x has {D}, pe has {pe.shape[1]}"

    itemsize = x.dtype.itemsize
    pe_s = pe[:S].astype(jnp.float32)                # tiny slice; add done in f32

    bt, ts = _choose_tiles(B, S, D, itemsize)
    grid = (pl.cdiv(B, bt), pl.cdiv(S, ts))

    # Explicit scoped-VMEM budget: covers double-buffered x-in + out + pe with
    # headroom, never above v7x's 64 MiB physical VMEM.
    x_block_bytes = bt * ts * D * itemsize
    pe_block_bytes = ts * D * 4
    vmem_need = 2 * (2 * x_block_bytes + pe_block_bytes)
    vmem_limit = int(min(64 << 20, max(32 << 20, vmem_need + (4 << 20))))

    out = pl.pallas_call(
        _pe_add_kernel,
        out_shape=jax.ShapeDtypeStruct((B, S, D), x.dtype),
        grid=grid,
        in_specs=[
            pl.BlockSpec((bt, ts, D), lambda b, s: (b, s, 0)),   # x tile
            pl.BlockSpec((ts, D), lambda b, s: (s, 0)),          # matching PE rows
        ],
        out_specs=pl.BlockSpec((bt, ts, D), lambda b, s: (b, s, 0)),
        input_output_aliases={0: 0},                 # reuse x's buffer when donatable
        compiler_params=pltpu.CompilerParams(
            dimension_semantics=("parallel", "parallel"),
            vmem_limit_bytes=vmem_limit,
        ),
    )(x, pe_s)

    # TODO(synk): nn.Dropout(p=0.1) is identity in eval mode (implemented here);
    # training-mode stochastic dropout with PyTorch-matching RNG is omitted.
    return out


if __name__ == "__main__":
    # Small shapes consistent with the module: batch=2, seq=8, d_model=32.
    B, S, D = 2, 8, 32
    MAX_LEN = 64  # small max_len for the synthetic test (module default 5000)

    key = jax.random.PRNGKey(0)
    x = jax.random.normal(key, (B, S, D), dtype=jnp.float32)
    pe = make_positional_encoding_table(D, max_len=MAX_LEN, dtype=jnp.float32)

    # Plain-JAX reference of the PyTorch forward (eval mode).
    ref = x + pe[:S][None, :, :]

    fwd = jax.jit(positional_encoding_forward)
    out = jax.block_until_ready(fwd(x, pe))

    assert out.shape == (B, S, D)
    assert out.dtype == x.dtype
    assert jnp.allclose(out, ref, atol=1e-6, rtol=1e-6)

    print("KERNEL_OK")
</pallas_src>

<mosaic_0001>
module attributes {stable_mosaic.version = 11 : i64} {
  func.func @_pe_add_kernel(%arg0: i32, %arg1: i32, %arg2: memref<1x8x32xf32, #tpu.memory_space<vmem>>, %arg3: memref<8x32xf32, #tpu.memory_space<vmem>>, %arg4: memref<1x8x32xf32, #tpu.memory_space<vmem>>) attributes {dimension_semantics = [#tpu.dimension_semantics<parallel>, #tpu.dimension_semantics<parallel>], iteration_bounds = array<i64: 2, 1>, scalar_prefetch = 0 : i64, scratch_operands = 0 : i64, tpu.core_type = #tpu.core_type<tc>, window_params = [{transform_indices = @transform_0, window_bounds = array<i64: 1, 8, 32>}, {transform_indices = @transform_1, window_bounds = array<i64: 8, 32>}, {transform_indices = @transform_2, window_bounds = array<i64: 1, 8, 32>}]} {
    %c0 = arith.constant 0 : index
    %c0_0 = arith.constant 0 : index
    %c0_1 = arith.constant 0 : index
    %0 = vector.load %arg2[%c0, %c0_0, %c0_1] : memref<1x8x32xf32, #tpu.memory_space<vmem>>, vector<1x8x32xf32>
    %c0_2 = arith.constant 0 : index
    %c0_3 = arith.constant 0 : index
    %1 = vector.load %arg3[%c0_2, %c0_3] : memref<8x32xf32, #tpu.memory_space<vmem>>, vector<8x32xf32>
    %2 = vector.shape_cast %1 : vector<8x32xf32> to vector<1x8x32xf32>
    %3 = arith.addf %0, %2 : vector<1x8x32xf32>
    %c0_4 = arith.constant 0 : index
    %c0_5 = arith.constant 0 : index
    %c0_6 = arith.constant 0 : index
    %4 = vector.load %arg4[%c0_4, %c0_5, %c0_6] : memref<1x8x32xf32, #tpu.memory_space<vmem>>, vector<1x8x32xf32>
    tpu.vector_store %arg4[%c0_4, %c0_5, %c0_6], %3 {strides = array<i32>} : memref<1x8x32xf32, #tpu.memory_space<vmem>>, vector<1x8x32xf32>,
    return
  }
  func.func @transform_0(%arg0: i32, %arg1: i32) -> (i32, i32, i32) {
    %c0_i32 = arith.constant 0 : i32
    %c0_i32_0 = arith.constant 0 : i32
    return %arg0, %arg1, %c0_i32 : i32, i32, i32
  }
  func.func @transform_1(%arg0: i32, %arg1: i32) -> (i32, i32) {
    %c0_i32 = arith.constant 0 : i32
    %c0_i32_0 = arith.constant 0 : i32
    return %arg1, %c0_i32 : i32, i32
  }
  func.func @transform_2(%arg0: i32, %arg1: i32) -> (i32, i32, i32) {
    %c0_i32 = arith.constant 0 : i32
    %c0_i32_0 = arith.constant 0 : i32
    return %arg0, %arg1, %c0_i32 : i32, i32, i32
  }
}

</mosaic_0001>

<bundles_post_ra>
// kernel: positional_encoding_forward.1
= control target key start
LH: loop header
LB: loop body
LE: loop exit
PB: predicated region body
PF: predicated region fallthrough
CT: control target
= control target key end

     0   :  { %7 = vsyncpa [#allocation3], 0  ;;  %s690_s0 = inlined_call_operand.hbm [shape: f32[2,8,32], index: 0, kind: input, shape index: {}, may-alias: {0,2}]   ;;  %s691_s1 = inlined_call_operand.vmem [shape: f32[8,32], index: 1, kind: input, shape index: {}]   ;;  %s692_s2 = inlined_call_operand.hbm [shape: f32[2,8,32], index: 2, kind: output, shape index: {}, may-alias: {0,2}]  }
   0x1   :  { %9 = vsyncpa [#allocation3 + $0x1], 0 }
   0x2   :  { %10 = vsyncpa [#allocation4], 0 }
   0x3   :  { %12 = vsyncpa [#allocation4 + $0x1], 0  ;;  %s515_s9 = smov 0   ;;  %s517_s10 = smov 0  }
   0x4   :  { %s519_s11 = smov 0   ;;  %s521_s12 = smov 0  }
   0x5   :  { %s523_s13 = smov 0   ;;  %s525_s14 = smov 0  }
   0x6 LB: > { %s308_s15 = sadd.s32 4294967295, %s496_s14   ;;  %s309_s16 = sadd.s32 4294967294, %s496_s14   ;;  %s496_s14 = sphi %s525_s14, %s18_s14   ;;  %s492_s13 = sphi %s523_s13, %s708_s13   ;;  %s488_s12 = sphi %s521_s12, %s707_s12   ;;  %s484_s11 = sphi %s519_s11, %s706_s11   ;;  %s480_s10 = sphi %s517_s10, %s705_s10   ;;  %s476_s9 = sphi %s515_s9, %s704_s9  }
   0x7   : > { %s30_s17 = sadd.s32 1, %s492_s13  ;;  %s39_s18 = sadd.s32 1, %s484_s11 }
   0x8   : > { %p32_p0 = scmp.ge.s32.totalorder %s30_s17, 2  ;;  %p46_p1 = scmp.ne.s32.totalorder %s484_s11, %s480_s10 }
   0x9   : > { %p47_p2 = scmp.eq.s32.totalorder %s496_s14, 0  ;;  %p52_p3 = scmp.ne.s32.totalorder %s480_s10, %s476_s9 }
   0xa   : > { %s710_s17 = smov (%p32_p0, %s30_s17), 0  ;;  %p53_p5 = scmp.eq.s32.totalorder %s308_s15, 0 }
   0xb   : > { %p556_p4 = por %p47_p2, %p46_p1  ;;  %s34_s20 = ssub.s32 %s492_s13, %s710_s17 }
   0xc   : > { %p104_p6 = scmp.eq.s32.totalorder %s308_s15, 1  ;;  %p37_p7 = scmp.eq.s32.totalorder %s34_s20, 0 }
   0xd   : > { %p562_p8 = por %p53_p5, %p52_p3  ;;  %p110_p10 = scmp.eq.s32.totalorder %s309_s16, 1 }
   0xe   : > { %p566_p9 = por %p104_p6, %p46_p1  ;;  %p334_p13 = scmp.lt.s32.totalorder %s496_s14, 2 }
   0xf   : > { %s571_s23 = scalar_select %p37_p7, %s484_s11, %s39_s18  }
  0x10   : > { %s696_s22 = scalar_select %p566_p9, 1, 0 }
  0x11   : > { %p573_p11 = por %p110_p10, %p52_p3  ;;  %s137_s25 = sand.u32 1, %s484_s11  }
  0x12   : > { %s313_s26 = sshll.u32 %s137_s25, 3  ;;  %s314_s27 = sshll.u32 %s492_s13, 7 }
  0x13   : > { %s697_s24 = scalar_select %p573_p11, 1, 0 }
  0x14   : > { %s584_s30 = scalar_lea.hbm %s690_s0, %s314_s27  ;;  %s141_s3 = scalar_lea.vmem [#allocation2], %s313_s26 }
  0x15   : > { %s149_s4 = sshll.u32 %s141_s3, 4  ;;  %p590_p0 = pnand %p334_p13, %p556_p4  ;;  %s586_s4 = int_to_ptr.vmem [resolvable:$true] %s149_s4 }
  0x16   : > { %s138_s6 = scalar_lea.sflag [#allocation3], %s137_s25  ;;  %s384_s7 = scalar_lea.hbm %s584_s30, 128 }
  0x17   : > { %p385_p3 = scmp.ne.s32.totalorder %s584_s30, %s384_s7  ;;  %p386_p5 = pneg %p590_p0 }
  0x18   : > { %s389_s16 = scalar_lea.hbm %s690_s0, 256  ;;  %p390_p4 = scmp.lt.u32.totalorder %s584_s30, %s690_s0 }
  0x19   : > { %p387_p6 = pnand %p386_p5, %p385_p3  ;;  %p391_p10 = scmp.lt.u32.totalorder %s389_s16, %s384_s7 }
  0x1a   : > { %p393_p12 = scmp.lt.u32.totalorder %s384_s7, %s584_s30 }
  0x1b   : > { %p388_p7 = pneg %p387_p6  ;;  %p392_p13 = por %p391_p10, %p390_p4 }
  0x1d   : > { %p394_p1 = por %p393_p12, %p392_p13 }
  0x1f   : > { %p395_p2 = pnand %p394_p1, %p388_p7 }
  0x21   : > { %398 = shalt.err (!%p395_p2)
}
  0x22   : > { %s399_s20 = scalar_lea.vmem %s586_s4, 128  ;;  %s498_s25 = smov [#allocation2]  }
  0x23   : > { %p400_p3 = scmp.ne.s32.totalorder %s586_s4, %s399_s20  ;;  %s404_s26 = sshll.u32 %s498_s25, 4  ;;  %s405_s26 = int_to_ptr.vmem [resolvable:$false] %s404_s26 }
  0x24   : > { %s406_s27 = scalar_lea.vmem %s405_s26, 256  ;;  %p407_p9 = scmp.lt.s32.totalorder %s586_s4, %s405_s26 }
  0x25   : > { %p402_p6 = pnand %p400_p3, %p386_p5  ;;  %p408_p4 = scmp.lt.s32.totalorder %s406_s27, %s399_s20 }
  0x27   : > { %p403_p11 = pneg %p402_p6  ;;  %p409_p10 = por %p408_p4, %p407_p9 }
  0x29   : > { %p410_p12 = pnand %p409_p10, %p403_p11 }
  0x2b   : > { %413 = shalt.err (!%p410_p12)
}
  0x2c   : > { %329 = dma.hbm_to_vmem [thread:$0]  (!%p590_p0), %s584_s30, 128, %s586_s4, %s138_s6  }
  0x2d   : > { %p699_p1 = scmp.lt.s32.totalorder %s496_s14, 3  ;;  %p700_p2 = scmp.ge.s32.totalorder %s496_s14, 1 }
  0x2f   : > { %p155_p5 = pnand %p700_p2, %p699_p1 }
  0x30   : > { %s626_s28 = sand.u32 (!%p155_p5), 1, %s480_s10  }
  0x31   : > { %158 = sbr.rel (%p155_p5) target bundleno = 83 (0x53), region = 28  ;;  %s316_s29 = sshll.u32 (!%p155_p5), %s626_s28, 3 }
  0x32   : > { %s161_s3 = scalar_lea.sflag (!%p155_p5), [#allocation3], %s626_s28  ;;  %s164_s7 = scalar_lea.vmem (!%p155_p5), [#allocation2], %s316_s29 }
  0x38   : > { %467 = dma.done.wait (%p562_p8), %s161_s3, 128  }
  0x39   : > { %469 = vsyncadd (%p562_p8), %s161_s3, 4294967168  ;;  %s188_s30 = scalar_lea.vmem [#allocation5], %s316_s29  ;;  %s319_s5 = sshll.u32 %s488_s12, 7  ;;  %v193_v0 = vld [vmem:[%s164_s7] sm:$0xff]  ;;  %v194_v1 = vld [vmem:[%s691_s1] sm:$0xff]  ;;  %vm196_vm0 = vcmask 261120  }
  0x3a   : > { %s213_s4 = sshll.u32 %s188_s30, 4  ;;  %v195_v2 = vadd.f32 %v194_v1, %v193_v0  ;;  %s643_s21 = scalar_lea.hbm %s692_s2, %s319_s5  ;;  %s638_s4 = int_to_ptr.vmem [resolvable:$true] %s213_s4 }
  0x3b   : > { %s199_s18 = scalar_lea.sflag [#allocation4], %s626_s28  ;;  %s414_s12 = scalar_lea.vmem %s638_s4, 128 }
  0x3c   : > { %197 = vst.msk [vmem:[%s188_s30] sm:$0xff] %vm196_vm0, %v195_v2  ;;  %p415_p8 = scmp.ne.s32.totalorder %s638_s4, %s414_s12  ;;  %p701_p9 = scmp.ne.s32.totalorder %s696_s22, 0 }
  0x3d   : > { %s499_s19 = smov [#allocation5]  }
  0x3e   : > { %p416_p11 = pnand %p415_p8, %p701_p9  ;;  %s418_s20 = sshll.u32 %s499_s19, 4  ;;  %s419_s20 = int_to_ptr.vmem [resolvable:$false] %s418_s20 }
  0x3f   : > { %s420_s25 = scalar_lea.vmem %s419_s20, 256  ;;  %p421_p7 = scmp.lt.s32.totalorder %s638_s4, %s419_s20 }
  0x40   : > { %p417_p0 = pneg %p416_p11  ;;  %p422_p13 = scmp.lt.s32.totalorder %s420_s25, %s414_s12 }
  0x42   : > { %p423_p3 = por %p422_p13, %p421_p7 }
  0x44   : > { %p424_p6 = pnand %p423_p3, %p417_p0 }
  0x46   : > { %427 = shalt.err (!%p424_p6)
}
  0x47   : > { %s428_s26 = scalar_lea.hbm %s643_s21, 128  ;;  %s432_s29 = scalar_lea.hbm %s692_s2, 256 }
  0x48   : > { %p429_p4 = scmp.ne.s32.totalorder %s643_s21, %s428_s26  ;;  %p433_p1 = scmp.lt.u32.totalorder %s643_s21, %s692_s2 }
  0x49   : > { %p434_p2 = scmp.lt.u32.totalorder %s432_s29, %s428_s26  ;;  %p436_p8 = scmp.lt.u32.totalorder %s428_s26, %s643_s21 }
  0x4a   : > { %p430_p10 = pnand %p429_p4, %p701_p9 }
  0x4b   : > { %p435_p5 = por %p434_p2, %p433_p1 }
  0x4c   : > { %p431_p12 = pneg %p430_p10 }
  0x4d   : > { %p437_p11 = por %p436_p8, %p435_p5 }
  0x4f   : > { %p438_p0 = pnand %p437_p11, %p431_p12 }
  0x51   : > { %441 = shalt.err (!%p438_p0)
}
  0x52   : > { %324 = dma.vmem_to_hbm [thread:$0]  (%p701_p9), %s638_s4, 128, %s643_s21, %s199_s18  }
  0x53 PF: > { %s225_s30 = sand.u32 1, %s476_s9   ;;  %p702_p7 = scmp.ne.s32.totalorder %s697_s24, 0 }
  0x54   : > { %p703_p13 = scmp.ge.s32.totalorder %s496_s14, 2  ;;  %s226_s5 = scalar_lea.sflag [#allocation4], %s225_s30 }
  0x56   : > { %p331_p3 = pnand %p703_p13, %p702_p7 }
  0x58   : > { %471 = dma.done.wait (!%p331_p3), %s226_s5, 128  }
  0x59   : > { %473 = vsyncadd (!%p331_p3), %s226_s5, 4294967168  ;;  %s18_s14 = sadd.s32 1, %s496_s14   ;;  %s704_s9 = smov %s480_s10 }
  0x5a   : > { %p15_p6 = scmp.ge.s32.totalorder %s18_s14, 4   ;;  %s705_s10 = smov %s484_s11 }
  0x5b   : > { %s706_s11 = smov %s571_s23  ;;  %s707_s12 = smov %s492_s13 }
  0x5c   : > { %s708_s13 = smov %s710_s17  ;;  %17 = sbr.rel (!%p15_p6) target bundleno = 6 (0x6), region = 76 }
  0x63   :  { %231 = vsyncpa [#allocation3], 1 }
  0x64   :  { %233 = vsyncpa [#allocation3 + $0x1], 1 }
  0x65   :  { %234 = vsyncpa [#allocation4], 1 }
  0x66   :  { %236 = vsyncpa [#allocation4 + $0x1], 1 }

</bundles_post_ra>
